<compile_context>
chip_gen: v6e
topology: v6e:2x2x1
jax: 0.10.0
libtpu: 0.0.40
codegen_flags: <defaults>
</compile_context>

<pallas_src>
import jax
import jax.numpy as jnp
from jax.experimental import pallas as pl
from jax.experimental.pallas import tpu as pltpu

IN_DIM = 28
IN_PAD = 32          # x padded to 32 lanes so the w1 slab rows are sublane-aligned
FC_DIM = 128
HID = 32
G = 4 * HID          # 128 fused gate lanes, order i|f|g|o
NHEAD = 4            # 1 critic + 3 actor outputs
STATE_W = 128        # lane-packed state width: 0:32 = h, 32:64 = c, rest unused

# Parameter slab row layout
R_W1, R_W2, R_WG, R_WH, R_B = 0, 32, 160, 320, 352
ROWS = 356


def _elu(v):
    # ELU(alpha=1): v if v > 0 else exp(v) - 1.  Clamp the exp argument so the discarded
    # branch never overflows (exp lowers to the EUP).
    return jnp.where(v > 0, v, jnp.exp(jnp.minimum(v, 0.0)) - 1.0)


def actor_kernel(x_ref, state_ref, w_ref, heads_ref, st_ref):
    t = pl.program_id(0)

    # The (B, 128) state output block has a constant index_map -> it stays VMEM-resident
    # across the whole grid and doubles as the recurrence carry.
    @pl.when(t == 0)
    def _():
        st_ref[...] = state_ref[...]

    x = x_ref[0]                          # (B, 32), lanes 28:32 are zero padding
    hx = st_ref[:, 0:HID]                 # (B, 32)
    cx = st_ref[:, HID:2 * HID]           # (B, 32)

    # fc1 + ELU, fc2 + ELU (biases are rows of the slab; they broadcast over B)
    h1 = _elu(jnp.dot(x, w_ref[R_W1:R_W2, :], preferred_element_type=jnp.float32)
              + w_ref[R_B:R_B + 1, :])
    h2 = _elu(jnp.dot(h1, w_ref[R_W2:R_WG, :], preferred_element_type=jnp.float32)
              + w_ref[R_B + 1:R_B + 2, :])

    # LSTMCell: single fused (B,160) @ (160,128) gate matmul, gate order i|f|g|o.
    cat = jnp.concatenate([h2, hx], axis=1)                       # (B, 160)
    gates = (jnp.dot(cat, w_ref[R_WG:R_WH, :], preferred_element_type=jnp.float32)
             + w_ref[R_B + 2:R_B + 3, :])                         # (B, 128)

    s_all = jax.nn.sigmoid(gates)         # one EUP push covers i, f, o
    t_all = jnp.tanh(gates)               # one EUP push covers g

    i_g = s_all[:, 0:HID]
    f_g = s_all[:, HID:2 * HID]
    g_g = t_all[:, 2 * HID:3 * HID]
    o_g = s_all[:, 3 * HID:4 * HID]

    cy = f_g * cx + i_g * g_g
    hy = o_g * jnp.tanh(cy)

    # Fused critic|actor head: (B,32) @ (32,128); lane 0 = critic, lanes 1:4 = actor.
    head = (jnp.dot(hy, w_ref[R_WH:R_B, :], preferred_element_type=jnp.float32)
            + w_ref[R_B + 3:R_B + 4, :])

    heads_ref[0] = head                   # lane-dense (B, 128) per-step store

    # Update the carry (written back to HBM once, after the last grid step).
    st_ref[:, 0:HID] = hy
    st_ref[:, HID:2 * HID] = cy


def init_params(key):
    ks = jax.random.split(key, 12)

    def xavier(k, fan_in, fan_out):
        std = jnp.sqrt(2.0 / (fan_in + fan_out))
        return (std * jax.random.normal(k, (fan_in, fan_out))).astype(jnp.float32)

    bound = 1.0 / (HID ** 0.5)

    def uni(k, shape):
        return jax.random.uniform(k, shape, jnp.float32, -bound, bound)

    w1 = xavier(ks[0], IN_DIM, FC_DIM)                 # (28, 128)
    b1 = uni(ks[1], (FC_DIM,))
    w2 = xavier(ks[2], FC_DIM, FC_DIM)                 # (128, 128)
    b2 = uni(ks[3], (FC_DIM,))
    w_gih = uni(ks[4], (FC_DIM, G))                    # (128, 128), gates i|f|g|o
    w_ghh = uni(ks[5], (HID, G))                       # (32, 128)
    b_g = uni(ks[6], (G,)) + uni(ks[7], (G,))          # bias_ih + bias_hh
    w_c = xavier(ks[8], HID, 1)
    b_c = uni(ks[9], (1,))
    w_a = xavier(ks[10], HID, 3)
    b_a = uni(ks[11], (3,))

    raw = dict(w1=w1, b1=b1, w2=w2, b2=b2, w_gih=w_gih, w_ghh=w_ghh, b_g=b_g,
               w_c=w_c, b_c=b_c, w_a=w_a, b_a=b_a)

    # Single lane-dense parameter slab -> one input DMA, VMEM-resident across all steps.
    slab = jnp.zeros((ROWS, 128), jnp.float32)
    slab = slab.at[R_W1:R_W1 + IN_DIM, :].set(w1)
    slab = slab.at[R_W2:R_WG, :].set(w2)
    slab = slab.at[R_WG:R_WG + FC_DIM, :].set(w_gih)
    slab = slab.at[R_WG + FC_DIM:R_WH, :].set(w_ghh)
    slab = slab.at[R_WH:R_B, 0:1].set(w_c)
    slab = slab.at[R_WH:R_B, 1:NHEAD].set(w_a)
    slab = slab.at[R_B + 0, :].set(b1)
    slab = slab.at[R_B + 1, :].set(b2)
    slab = slab.at[R_B + 2, :].set(b_g)
    slab = slab.at[R_B + 3, 0:1].set(b_c)
    slab = slab.at[R_B + 3, 1:NHEAD].set(b_a)
    return raw, slab


def _actor_forward(x_seq, hx0, cx0, slab):
    T, B, _ = x_seq.shape
    x_pad = jnp.pad(x_seq, ((0, 0), (0, 0), (0, IN_PAD - IN_DIM)))
    state0 = jnp.concatenate(
        [hx0, cx0, jnp.zeros((B, STATE_W - 2 * HID), jnp.float32)], axis=1)

    heads, out_state = pl.pallas_call(
        actor_kernel,
        out_shape=(jax.ShapeDtypeStruct((T, B, 128), jnp.float32),
                   jax.ShapeDtypeStruct((B, STATE_W), jnp.float32)),
        grid=(T,),
        in_specs=[
            pl.BlockSpec((1, B, IN_PAD), lambda t: (t, 0, 0)),   # per-step x slice
            pl.BlockSpec((B, STATE_W), lambda t: (0, 0)),        # packed initial state
            pl.BlockSpec((ROWS, 128), lambda t: (0, 0)),         # parameter slab (resident)
        ],
        out_specs=(
            pl.BlockSpec((1, B, 128), lambda t: (t, 0, 0)),      # per-step heads
            pl.BlockSpec((B, STATE_W), lambda t: (0, 0)),        # final state (carry)
        ),
        compiler_params=pltpu.CompilerParams(
            dimension_semantics=("arbitrary",)),                 # strictly sequential recurrence
    )(x_pad, state0, slab)

    critic = heads[:, :, 0:1]          # (T, B, 1)
    actor = heads[:, :, 1:NHEAD]       # (T, B, 3)
    hy = out_state[:, 0:HID]
    cy = out_state[:, HID:2 * HID]
    return critic, actor, (hy, cy)


actor_forward = jax.jit(_actor_forward)


def actor_step_ref(x, hx, cx, p):
    h1 = _elu(x @ p["w1"] + p["b1"])
    h2 = _elu(h1 @ p["w2"] + p["b2"])
    gates = h2 @ p["w_gih"] + hx @ p["w_ghh"] + p["b_g"]
    i_g = jax.nn.sigmoid(gates[:, 0:HID])
    f_g = jax.nn.sigmoid(gates[:, HID:2 * HID])
    g_g = jnp.tanh(gates[:, 2 * HID:3 * HID])
    o_g = jax.nn.sigmoid(gates[:, 3 * HID:4 * HID])
    cy = f_g * cx + i_g * g_g
    hy = o_g * jnp.tanh(cy)
    critic = hy @ p["w_c"] + p["b_c"]
    actor = hy @ p["w_a"] + p["b_a"]
    return critic, actor, hy, cy


if __name__ == "__main__":
    key = jax.random.PRNGKey(0)
    kp, kx, kh, kc = jax.random.split(key, 4)

    T, B = 8, 2
    raw, slab = init_params(kp)
    x_seq = jax.random.normal(kx, (T, B, IN_DIM), jnp.float32)
    hx0 = jax.random.normal(kh, (B, HID), jnp.float32)
    cx0 = jax.random.normal(kc, (B, HID), jnp.float32)

    critic, actor, (hy, cy) = actor_forward(x_seq, hx0, cx0, slab)
    jax.block_until_ready((critic, actor, hy, cy))

    # Pure-JAX reference: the same Actor.forward applied step by step.
    hx_r, cx_r = hx0, cx0
    crs, ars = [], []
    for t in range(T):
        cr, ar, hx_r, cx_r = actor_step_ref(x_seq[t], hx_r, cx_r, raw)
        crs.append(cr)
        ars.append(ar)
    critic_r = jnp.stack(crs)
    actor_r = jnp.stack(ars)

    assert critic.shape == (T, B, 1) and actor.shape == (T, B, 3)
    assert hy.shape == (B, HID) and cy.shape == (B, HID)
    assert jnp.allclose(critic, critic_r, atol=1e-4)
    assert jnp.allclose(actor, actor_r, atol=1e-4)
    assert jnp.allclose(hy, hx_r, atol=1e-4)
    assert jnp.allclose(cy, cx_r, atol=1e-4)

    print("KERNEL_OK")
</pallas_src>

<mosaic_0001>
module attributes {stable_mosaic.version = 11 : i64} {
  func.func @actor_kernel(%arg0: i32, %arg1: memref<1x2x32xf32, #tpu.memory_space<vmem>>, %arg2: memref<2x128xf32, #tpu.memory_space<vmem>>, %arg3: memref<356x128xf32, #tpu.memory_space<vmem>>, %arg4: memref<1x2x128xf32, #tpu.memory_space<vmem>>, %arg5: memref<2x128xf32, #tpu.memory_space<vmem>>) attributes {dimension_semantics = [#tpu.dimension_semantics<arbitrary>], iteration_bounds = array<i64: 8>, scalar_prefetch = 0 : i64, scratch_operands = 0 : i64, tpu.core_type = #tpu.core_type<tc>, window_params = [{transform_indices = @transform_0, window_bounds = array<i64: 1, 2, 32>}, {pipeline_mode = #tpu.pipeline_mode<synchronous>, transform_indices = @transform_1, window_bounds = array<i64: 2, 128>}, {pipeline_mode = #tpu.pipeline_mode<synchronous>, transform_indices = @transform_2, window_bounds = array<i64: 356, 128>}, {transform_indices = @transform_3, window_bounds = array<i64: 1, 2, 128>}, {pipeline_mode = #tpu.pipeline_mode<synchronous>, transform_indices = @transform_4, window_bounds = array<i64: 2, 128>}]} {
    %c0_i32 = arith.constant 0 : i32
    %0 = arith.cmpi eq, %arg0, %c0_i32 : i32
    %1 = arith.extui %0 : i1 to i32
    %c0_i32_0 = arith.constant 0 : i32
    %2 = arith.cmpi ne, %1, %c0_i32_0 : i32
    scf.if %2 {
      %c0_33 = arith.constant 0 : index
      %c0_34 = arith.constant 0 : index
      %64 = vector.load %arg2[%c0_33, %c0_34] : memref<2x128xf32, #tpu.memory_space<vmem>>, vector<2x128xf32>
      %c0_35 = arith.constant 0 : index
      %c0_36 = arith.constant 0 : index
      %65 = vector.load %arg5[%c0_35, %c0_36] : memref<2x128xf32, #tpu.memory_space<vmem>>, vector<2x128xf32>
      tpu.vector_store %arg5[%c0_35, %c0_36], %64 {strides = array<i32>} : memref<2x128xf32, #tpu.memory_space<vmem>>, vector<2x128xf32>,
    } else {
    }
    %c0 = arith.constant 0 : index
    %c0_1 = arith.constant 0 : index
    %c0_2 = arith.constant 0 : index
    %3 = vector.load %arg1[%c0, %c0_1, %c0_2] : memref<1x2x32xf32, #tpu.memory_space<vmem>>, vector<1x2x32xf32>
    %4 = vector.shape_cast %3 : vector<1x2x32xf32> to vector<2x32xf32>
    %c0_3 = arith.constant 0 : index
    %c0_4 = arith.constant 0 : index
    %5 = vector.load %arg5[%c0_3, %c0_4] : memref<2x128xf32, #tpu.memory_space<vmem>>, vector<2x32xf32>
    %c0_5 = arith.constant 0 : index
    %c32 = arith.constant 32 : index
    %6 = vector.load %arg5[%c0_5, %c32] : memref<2x128xf32, #tpu.memory_space<vmem>>, vector<2x32xf32>
    %c0_6 = arith.constant 0 : index
    %c0_7 = arith.constant 0 : index
    %7 = vector.load %arg3[%c0_6, %c0_7] : memref<356x128xf32, #tpu.memory_space<vmem>>, vector<32x128xf32>
    %cst = arith.constant dense<0.000000e+00> : vector<2x128xf32>
    %8 = tpu.matmul %4, %7, %cst {dimension_numbers = #tpu.dot_dimension_numbers<[1], [0], [0], [1], [0, 0, 1, 1], [], []>} : vector<2x32xf32>, vector<32x128xf32>, vector<2x128xf32> -> vector<2x128xf32>
    %c352 = arith.constant 352 : index
    %c0_8 = arith.constant 0 : index
    %9 = vector.load %arg3[%c352, %c0_8] : memref<356x128xf32, #tpu.memory_space<vmem>>, vector<1x128xf32>
    %10 = vector.broadcast %9 : vector<1x128xf32> to vector<2x128xf32>
    %11 = arith.addf %8, %10 : vector<2x128xf32>
    %cst_9 = arith.constant 0.000000e+00 : f32
    %12 = vector.broadcast %cst_9 : f32 to vector<2x128xf32>
    %13 = arith.cmpf ogt, %11, %12 : vector<2x128xf32>
    %cst_10 = arith.constant 0.000000e+00 : f32
    %14 = vector.broadcast %cst_10 : f32 to vector<2x128xf32>
    %15 = arith.minimumf %11, %14 : vector<2x128xf32>
    %16 = math.exp %15 : vector<2x128xf32>
    %cst_11 = arith.constant 1.000000e+00 : f32
    %17 = vector.broadcast %cst_11 : f32 to vector<2x128xf32>
    %18 = arith.subf %16, %17 : vector<2x128xf32>
    %19 = arith.select %13, %11, %18 : vector<2x128xi1>, vector<2x128xf32>
    %c32_12 = arith.constant 32 : index
    %c0_13 = arith.constant 0 : index
    %20 = vector.load %arg3[%c32_12, %c0_13] : memref<356x128xf32, #tpu.memory_space<vmem>>, vector<128x128xf32>
    %cst_14 = arith.constant dense<0.000000e+00> : vector<2x128xf32>
    %21 = tpu.matmul %19, %20, %cst_14 {dimension_numbers = #tpu.dot_dimension_numbers<[1], [0], [0], [1], [0, 0, 1, 1], [], []>} : vector<2x128xf32>, vector<128x128xf32>, vector<2x128xf32> -> vector<2x128xf32>
    %c353 = arith.constant 353 : index
    %c0_15 = arith.constant 0 : index
    %22 = vector.load %arg3[%c353, %c0_15] : memref<356x128xf32, #tpu.memory_space<vmem>>, vector<1x128xf32>
    %23 = vector.broadcast %22 : vector<1x128xf32> to vector<2x128xf32>
    %24 = arith.addf %21, %23 : vector<2x128xf32>
    %cst_16 = arith.constant 0.000000e+00 : f32
    %25 = vector.broadcast %cst_16 : f32 to vector<2x128xf32>
    %26 = arith.cmpf ogt, %24, %25 : vector<2x128xf32>
    %cst_17 = arith.constant 0.000000e+00 : f32
    %27 = vector.broadcast %cst_17 : f32 to vector<2x128xf32>
    %28 = arith.minimumf %24, %27 : vector<2x128xf32>
    %29 = math.exp %28 : vector<2x128xf32>
    %cst_18 = arith.constant 1.000000e+00 : f32
    %30 = vector.broadcast %cst_18 : f32 to vector<2x128xf32>
    %31 = arith.subf %29, %30 : vector<2x128xf32>
    %32 = arith.select %26, %24, %31 : vector<2x128xi1>, vector<2x128xf32>
    %33 = tpu.concatenate %32, %5 in 1 : vector<2x128xf32>, vector<2x32xf32> -> vector<2x160xf32>
    %c160 = arith.constant 160 : index
    %c0_19 = arith.constant 0 : index
    %34 = vector.load %arg3[%c160, %c0_19] : memref<356x128xf32, #tpu.memory_space<vmem>>, vector<160x128xf32>
    %cst_20 = arith.constant dense<0.000000e+00> : vector<2x128xf32>
    %35 = tpu.matmul %33, %34, %cst_20 {dimension_numbers = #tpu.dot_dimension_numbers<[1], [0], [0], [1], [0, 0, 1, 1], [], []>} : vector<2x160xf32>, vector<160x128xf32>, vector<2x128xf32> -> vector<2x128xf32>
    %c354 = arith.constant 354 : index
    %c0_21 = arith.constant 0 : index
    %36 = vector.load %arg3[%c354, %c0_21] : memref<356x128xf32, #tpu.memory_space<vmem>>, vector<1x128xf32>
    %37 = vector.broadcast %36 : vector<1x128xf32> to vector<2x128xf32>
    %38 = arith.addf %35, %37 : vector<2x128xf32>
    %39 = arith.negf %38 : vector<2x128xf32>
    %40 = math.exp %39 : vector<2x128xf32>
    %cst_22 = arith.constant 1.000000e+00 : f32
    %41 = vector.broadcast %cst_22 : f32 to vector<2x128xf32>
    %42 = arith.addf %41, %40 : vector<2x128xf32>
    %43 = arith.divf %41, %42 : vector<2x128xf32>
    %44 = math.tanh %38 : vector<2x128xf32>
    %45 = vector.extract_strided_slice %43 {offsets = [0, 0], sizes = [2, 32], strides = [1, 1]} : vector<2x128xf32> to vector<2x32xf32>
    %46 = vector.extract_strided_slice %43 {offsets = [0, 32], sizes = [2, 32], strides = [1, 1]} : vector<2x128xf32> to vector<2x32xf32>
    %47 = vector.extract_strided_slice %44 {offsets = [0, 64], sizes = [2, 32], strides = [1, 1]} : vector<2x128xf32> to vector<2x32xf32>
    %48 = vector.extract_strided_slice %43 {offsets = [0, 96], sizes = [2, 32], strides = [1, 1]} : vector<2x128xf32> to vector<2x32xf32>
    %49 = arith.mulf %46, %6 : vector<2x32xf32>
    %50 = arith.mulf %45, %47 : vector<2x32xf32>
    %51 = arith.addf %49, %50 : vector<2x32xf32>
    %52 = math.tanh %51 : vector<2x32xf32>
    %53 = arith.mulf %48, %52 : vector<2x32xf32>
    %c320 = arith.constant 320 : index
    %c0_23 = arith.constant 0 : index
    %54 = vector.load %arg3[%c320, %c0_23] : memref<356x128xf32, #tpu.memory_space<vmem>>, vector<32x128xf32>
    %cst_24 = arith.constant dense<0.000000e+00> : vector<2x128xf32>
    %55 = tpu.matmul %53, %54, %cst_24 {dimension_numbers = #tpu.dot_dimension_numbers<[1], [0], [0], [1], [0, 0, 1, 1], [], []>} : vector<2x32xf32>, vector<32x128xf32>, vector<2x128xf32> -> vector<2x128xf32>
    %c355 = arith.constant 355 : index
    %c0_25 = arith.constant 0 : index
    %56 = vector.load %arg3[%c355, %c0_25] : memref<356x128xf32, #tpu.memory_space<vmem>>, vector<1x128xf32>
    %57 = vector.broadcast %56 : vector<1x128xf32> to vector<2x128xf32>
    %58 = arith.addf %55, %57 : vector<2x128xf32>
    %c0_26 = arith.constant 0 : index
    %c0_27 = arith.constant 0 : index
    %c0_28 = arith.constant 0 : index
    %59 = vector.load %arg4[%c0_26, %c0_27, %c0_28] : memref<1x2x128xf32, #tpu.memory_space<vmem>>, vector<1x2x128xf32>
    %60 = vector.shape_cast %59 : vector<1x2x128xf32> to vector<2x128xf32>
    %61 = vector.shape_cast %58 : vector<2x128xf32> to vector<1x2x128xf32>
    tpu.vector_store %arg4[%c0_26, %c0_27, %c0_28], %61 {strides = array<i32>} : memref<1x2x128xf32, #tpu.memory_space<vmem>>, vector<1x2x128xf32>,
    %c0_29 = arith.constant 0 : index
    %c0_30 = arith.constant 0 : index
    %62 = vector.load %arg5[%c0_29, %c0_30] : memref<2x128xf32, #tpu.memory_space<vmem>>, vector<2x32xf32>
    tpu.vector_store %arg5[%c0_29, %c0_30], %53 {strides = array<i32>} : memref<2x128xf32, #tpu.memory_space<vmem>>, vector<2x32xf32>,
    %c0_31 = arith.constant 0 : index
    %c32_32 = arith.constant 32 : index
    %63 = vector.load %arg5[%c0_31, %c32_32] : memref<2x128xf32, #tpu.memory_space<vmem>>, vector<2x32xf32>
    tpu.vector_store %arg5[%c0_31, %c32_32], %51 {strides = array<i32>} : memref<2x128xf32, #tpu.memory_space<vmem>>, vector<2x32xf32>,
    return
  }
  func.func @transform_0(%arg0: i32) -> (i32, i32, i32) {
    %c0_i32 = arith.constant 0 : i32
    %c0_i32_0 = arith.constant 0 : i32
    %c0_i32_1 = arith.constant 0 : i32
    return %arg0, %c0_i32, %c0_i32_0 : i32, i32, i32
  }
  func.func @transform_1(%arg0: i32) -> (i32, i32) {
    %c0_i32 = arith.constant 0 : i32
    %c0_i32_0 = arith.constant 0 : i32
    %c0_i32_1 = arith.constant 0 : i32
    return %c0_i32, %c0_i32_0 : i32, i32
  }
  func.func @transform_2(%arg0: i32) -> (i32, i32) {
    %c0_i32 = arith.constant 0 : i32
    %c0_i32_0 = arith.constant 0 : i32
    %c0_i32_1 = arith.constant 0 : i32
    return %c0_i32, %c0_i32_0 : i32, i32
  }
  func.func @transform_3(%arg0: i32) -> (i32, i32, i32) {
    %c0_i32 = arith.constant 0 : i32
    %c0_i32_0 = arith.constant 0 : i32
    %c0_i32_1 = arith.constant 0 : i32
    return %arg0, %c0_i32, %c0_i32_0 : i32, i32, i32
  }
  func.func @transform_4(%arg0: i32) -> (i32, i32) {
    %c0_i32 = arith.constant 0 : i32
    %c0_i32_0 = arith.constant 0 : i32
    %c0_i32_1 = arith.constant 0 : i32
    return %c0_i32, %c0_i32_0 : i32, i32
  }
}

</mosaic_0001>

<bundles_post_ra>
// kernel: _actor_forward.1
= control target key start
LH: loop header
LB: loop body
LE: loop exit
PB: predicated region body
PF: predicated region fallthrough
CT: control target
= control target key end

     0   :  { %10 = vsyncpa [#allocation3], 0  ;;  %s896_s15 = smov 0   ;;  %s1009_s0 = inlined_call_operand.vmem [shape: f32[8,2,32], index: 0, kind: input, shape index: {}]   ;;  %s1010_s1 = inlined_call_operand.vmem [shape: f32[2,128], index: 1, kind: input, shape index: {}]   ;;  %s1011_s2 = inlined_call_operand.hbm [shape: f32[356,128], index: 2, kind: input, shape index: {}]   ;;  %s1012_s3 = inlined_call_operand.vmem [shape: f32[8,2,128], index: 3, kind: output, shape index: {0}]   ;;  %s1013_s4 = inlined_call_operand.vmem [shape: f32[2,128], index: 4, kind: output, shape index: {1}]  }
   0x1 LB: > { %s902_s16 = sadd.s32 4294967295, %s862_s15   ;;  %p685_p0 = scmp.ge.s32.totalorder %s862_s15, 1  ;;  %s862_s15 = sphi %s896_s15, %s16_s15  }
   0x2   : > { %p136_p1 = scmp.lt.s32.totalorder %s862_s15, 9  ;;  %s864_s17 = smov [#allocation2]  }
   0x3   : > { %s151_s18 = sshll.u32 %s864_s17, 4  ;;  %p797_p4 = scmp.eq.s32.totalorder %s902_s16, 0  ;;  %s152_s18 = int_to_ptr.vmem [resolvable:$true] %s151_s18 }
   0x4   : > { %p907_p3 = pnand %p685_p0, %p136_p1  ;;  %s837_s20 = scalar_lea.vmem %s152_s18, 5760 }
   0x5   : > { %p838_p8 = scmp.ne.s32.totalorder %s152_s18, %s837_s20  ;;  %p845_p11 = scmp.lt.s32.totalorder %s152_s18, %s152_s18 }
   0x6   : > { %p793_p5 = pneg %p907_p3  ;;  %p846_p12 = scmp.lt.s32.totalorder %s837_s20, %s837_s20 }
   0x8   : > { %p794_p6 = pnand %p797_p4, %p793_p5  ;;  %p847_p13 = por %p846_p12, %p845_p11 }
   0xa   : > { %p828_p7 = pneg %p794_p6 }
   0xc   : > { %p840_p9 = pnand %p838_p8, %p828_p7 }
   0xe   : > { %p841_p10 = pneg %p840_p9 }
  0x10   : > { %p848_p2 = pnand %p847_p13, %p841_p10 }
  0x12   : > { %851 = shalt.err (!%p848_p2)
}
  0x13   : > { %s865_s21 = smov 128   ;;  %s866_s22 = smov 8  }
  0x14   : > { %796 = dma.hbm_to_vmem [thread:$0]  (!%p794_p6), %s1011_s2, 5760, %s152_s18, [#allocation3], %s865_s21, %s865_s21, %s866_s22  }
  0x15   : > { %174 = sbr.rel (%p907_p3) target bundleno = 1363 (0x553), region = 32 }
  0x1a   : > { %857 = dma.done.wait (%p797_p4), [#allocation3], 5760  }
  0x1b   : > { %859 = vsyncadd (%p797_p4), [#allocation3], 4294961536  ;;  %p198_p0 = scmp.lt.s32.totalorder %s902_s16, 7  ;;  %p1015_p1 = scmp.ne.s32.totalorder %s902_s16, 0 }
  0x1d   : > { %s199_s25 = scalar_select %p198_p0, %s902_s16, 7 }
  0x1e   : > { %209 = sbr.rel (%p1015_p1) target bundleno = 37 (0x25), region = 40 }
  0x1f   : > { %s690_s26 = sshll.u32 %s199_s25, 1 }
  0x20   : > { %s201_s29 = scalar_lea.vmem %s1009_s0, %s690_s26  ;;  %s933_s6 = scalar_lea.vmem %s1012_s3, %s690_s26 }
  0x23   : > { %v210_v0 = vld [vmem:[%s1010_s1] sm:$0x3] }
  0x24   : > { %211 = vst [vmem:[%s1013_s4] sm:$0x3] %v210_v0 }
  0x25 PF: > { %v217_v1 = vld [vmem:[#allocation2 + $0x18] sm:$0xff]  ;;  %v867_v2 = vmov 0.0   ;;  %v216_v3 = vld [vmem:[#allocation2 + $0x10] sm:$0xff]  ;;  %vm868_vm0 = vmmov 0   ;;  %v215_v6 = vld [vmem:[#allocation2 + $0x8] sm:$0xff]  ;;  %vm223_vm1 = vcmask 261120  }
  0x26   : > { %732 = vmatprep.subr.mxu0 %v867_v2  ;;  %740 = vmatprep.mubr.msk.f32.mxu0 %vm868_vm0, %v867_v2  ;;  %v318_v4 = vld [vmem:[#allocation2 + $0x98] sm:$0xff]  ;;  %v317_v5 = vld [vmem:[#allocation2 + $0x90] sm:$0xff]  ;;  %v316_v7 = vld [vmem:[#allocation2 + $0x88] sm:$0xff]  ;;  %s869_s13 = smov 64   ;;  %s870_s14 = smov 32   ;;  %vm608_vm4 = vcmask 254976  }
  0x27   : > { %733 = vmatpush3.msra.mxu0 %v217_v1  ;;  %743 = vmatprep.subr.mxu1 %v867_v2  ;;  %v214_v8 = vld [vmem:[#allocation2] sm:$0xff]  ;;  %v314_v11 = vld [vmem:[#allocation2 + $0x78] sm:$0xff]  ;;  %v313_v12 = vld [vmem:[#allocation2 + $0x70] sm:$0xff]  ;;  %vm610_vm5 = vcmask 517376  }
  0x28   : > { %734 = vmatprep.subr.mxu0 %v867_v2  ;;  %744 = vmatpush3.msra.mxu1 %v318_v4  ;;  %v212_v9 = vld [vmem:[%s201_s29] sm:$0x3]  ;;  %v312_v13 = vld [vmem:[#allocation2 + $0x68] sm:$0xff]  ;;  %v310_v15 = vld [vmem:[#allocation2 + $0x58] sm:$0xff] }
  0x29   : > { %735 = vmatpush3.msra.mxu0 %v216_v3  ;;  %745 = vmatprep.subr.mxu1 %v867_v2  ;;  %v315_v10 = vld [vmem:[#allocation2 + $0x80] sm:$0xff]  ;;  %v309_v16 = vld [vmem:[#allocation2 + $0x50] sm:$0xff]  ;;  %v308_v17 = vld [vmem:[#allocation2 + $0x48] sm:$0xff] }
  0x2a   : > { %736 = vmatprep.subr.mxu0 %v867_v2  ;;  %746 = vmatpush3.msra.mxu1 %v317_v5  ;;  %v311_v14 = vld [vmem:[#allocation2 + $0x60] sm:$0xff]  ;;  %v306_v19 = vld [vmem:[#allocation2 + $0x38] sm:$0xff]  ;;  %v305_v20 = vld [vmem:[#allocation2 + $0x30] sm:$0xff] }
  0x2b   : > { %737 = vmatpush3.msra.mxu0 %v215_v6  ;;  %747 = vmatprep.subr.mxu1 %v867_v2  ;;  %v307_v18 = vld [vmem:[#allocation2 + $0x40] sm:$0xff]  ;;  %v304_v21 = vld [vmem:[#allocation2 + $0x28] sm:$0xff]  ;;  %v415_v23 = vld [vmem:[#allocation2 + $0x118] sm:$0xff] }
  0x2c   : > { %738 = vmatprep.subr.mxu0 %v867_v2  ;;  %748 = vmatpush3.msra.mxu1 %v316_v7  ;;  %v303_v22 = vld [vmem:[#allocation2 + $0x20] sm:$0xff]  ;;  %v414_v24 = vld [vmem:[#allocation2 + $0x110] sm:$0xff]  ;;  %v413_v25 = vld [vmem:[#allocation2 + $0x108] sm:$0xff] }
  0x2d   : > { %739 = vmatpush3.msra.mxu0 %v214_v8  ;;  %749 = vmatprep.subr.mxu1 %v867_v2  ;;  %v412_v26 = vld [vmem:[#allocation2 + $0x100] sm:$0xff]  ;;  %v411_v27 = vld [vmem:[#allocation2 + $0xf8] sm:$0xff]  ;;  %v410_v28 = vld [vmem:[#allocation2 + $0xf0] sm:$0xff] }
  0x2e   : > { %741 = vmatmul.mubr.msk.f32.vlgmr.msra.gmra.mxu0 %vm223_vm1, %v212_v9  ;;  %750 = vmatpush3.msra.mxu1 %v315_v10  ;;  %v409_v29 = vld [vmem:[#allocation2 + $0xe8] sm:$0xff]  ;;  %v408_v30 = vld [vmem:[#allocation2 + $0xe0] sm:$0xff]  ;;  %v407_v40 = vld [vmem:[#allocation2 + $0xd8] sm:$0xff] }
  0x2f   : > { %751 = vmatprep.subr.mxu1 %v867_v2  ;;  %775 = vmatprep.mubr.msk.f32.mxu1 %vm868_vm0, %v867_v2  ;;  %v693_v31 = vld [vmem:[#allocation2 + $0x160] ss:$0 sm:$0xff]  ;;  %v406_v41 = vld [vmem:[#allocation2 + $0xd0] sm:$0xff]  ;;  %v405_v42 = vld [vmem:[#allocation2 + $0xc8] sm:$0xff] }
  0x30   : > { %428 = vmatprep.subr.mxu0 %v867_v2  ;;  %752 = vmatpush3.msra.mxu1 %v314_v11  ;;  %v404_v43 = vld [vmem:[#allocation2 + $0xc0] sm:$0xff]  ;;  %v403_v44 = vld [vmem:[#allocation2 + $0xb8] sm:$0xff]  ;;  %v402_v45 = vld [vmem:[#allocation2 + $0xb0] sm:$0xff] }
  0x31   : > { %753 = vmatprep.subr.mxu1 %v867_v2  ;;  %429 = vmatpush1.msra.mxu0 %v415_v23  ;;  %v213_v46 = vld [vmem:[%s1013_s4] sm:$0x3]  ;;  %v401_v47 = vld [vmem:[#allocation2 + $0xa8] sm:$0xff]  ;;  %v419_v49 = vld [vmem:[#allocation2 + $0x138] sm:$0xff] }
  0x32   : > { %754 = vmatpush3.msra.mxu1 %v313_v12  ;;  %430 = vmatprep.subr.mxu0 %v867_v2  ;;  %v400_v48 = vld [vmem:[#allocation2 + $0xa0] sm:$0xff]  ;;  %v418_v50 = vld [vmem:[#allocation2 + $0x130] sm:$0xff]  ;;  %v417_v51 = vld [vmem:[#allocation2 + $0x128] sm:$0xff] }
  0x33   : > { %755 = vmatprep.subr.mxu1 %v867_v2  ;;  %431 = vmatpush1.msra.mxu0 %v414_v24  ;;  %v416_v52 = vld [vmem:[#allocation2 + $0x120] sm:$0xff] }
  0x34   : > { %756 = vmatpush3.msra.mxu1 %v312_v13  ;;  %432 = vmatprep.subr.mxu0 %v867_v2  ;;  %v696_v53 = vld [vmem:[#allocation2 + $0x161] ss:$0 sm:$0xff]  ;;  %v698_v62 = vld [vmem:[#allocation2 + $0x162] ss:$0 sm:$0xff]  ;;  %v525_v13 = vld [vmem:[#allocation2 + $0x158] sm:$0xff] }
  0x35   : > { %757 = vmatprep.subr.mxu1 %v867_v2  ;;  %433 = vmatpush1.msra.mxu0 %v413_v25 }
  0x36   : > { %758 = vmatpush3.msra.mxu1 %v311_v14  ;;  %434 = vmatprep.subr.mxu0 %v867_v2  ;;  %v524_v14 = vld [vmem:[#allocation2 + $0x150] sm:$0xff] }
  0x37   : > { %759 = vmatprep.subr.mxu1 %v867_v2  ;;  %435 = vmatpush1.msra.mxu0 %v412_v26 }
  0x38   : > { %760 = vmatpush3.msra.mxu1 %v310_v15  ;;  %436 = vmatprep.subr.mxu0 %v867_v2  ;;  %v523_v15 = vld [vmem:[#allocation2 + $0x148] sm:$0xff] }
  0x39   : > { %761 = vmatprep.subr.mxu1 %v867_v2  ;;  %437 = vmatpush1.msra.mxu0 %v411_v27 }
  0x3a   : > { %762 = vmatpush3.msra.mxu1 %v309_v16  ;;  %438 = vmatprep.subr.mxu0 %v867_v2  ;;  %v522_v16 = vld [vmem:[#allocation2 + $0x140] sm:$0xff] }
  0x3b   : > { %763 = vmatprep.subr.mxu1 %v867_v2  ;;  %439 = vmatpush1.msra.mxu0 %v410_v28 }
  0x3c   : > { %764 = vmatpush3.msra.mxu1 %v308_v17  ;;  %440 = vmatprep.subr.mxu0 %v867_v2 }
  0x3d   : > { %765 = vmatprep.subr.mxu1 %v867_v2  ;;  %441 = vmatpush1.msra.mxu0 %v409_v29 }
  0x3e   : > { %766 = vmatpush3.msra.mxu1 %v307_v18  ;;  %442 = vmatprep.subr.mxu0 %v867_v2 }
  0x3f   : > { %767 = vmatprep.subr.mxu1 %v867_v2  ;;  %443 = vmatpush1.msra.mxu0 %v408_v30 }
  0x40   : > { %768 = vmatpush3.msra.mxu1 %v306_v19  ;;  %444 = vmatprep.subr.mxu0 %v867_v2 }
  0x41   : > { %769 = vmatprep.subr.mxu1 %v867_v2  ;;  %445 = vmatpush1.msra.mxu0 %v407_v40 }
  0x42   : > { %770 = vmatpush3.msra.mxu1 %v305_v20  ;;  %446 = vmatprep.subr.mxu0 %v867_v2 }
  0x43   : > { %771 = vmatprep.subr.mxu1 %v867_v2  ;;  %447 = vmatpush1.msra.mxu0 %v406_v41 }
  0x44   : > { %772 = vmatpush3.msra.mxu1 %v304_v21  ;;  %448 = vmatprep.subr.mxu0 %v867_v2 }
  0x45   : > { %773 = vmatprep.subr.mxu1 %v867_v2  ;;  %449 = vmatpush1.msra.mxu0 %v405_v42 }
  0x46   : > { %774 = vmatpush3.msra.mxu1 %v303_v22  ;;  %450 = vmatprep.subr.mxu0 %v867_v2 }
  0x47   : > { %778 = vmatprep.subr.mxu1 %v867_v2  ;;  %451 = vmatpush1.msra.mxu0 %v404_v43 }
  0x48   : > { %452 = vmatprep.subr.mxu0 %v867_v2  ;;  %699 = vmatprep.mubr.msk.f32.mxu0 %vm223_vm1, %v213_v46 }
  0x49   : > { %453 = vmatpush1.msra.mxu0 %v403_v44 }
  0x4a   : > { %454 = vmatprep.subr.mxu0 %v867_v2 }
  0x4b   : > { %455 = vmatpush1.msra.mxu0 %v402_v45 }
  0x4c   : > { %456 = vmatprep.subr.mxu0 %v867_v2 }
  0x4d   : > { %457 = vmatpush1.msra.mxu0 %v401_v47 }
  0x4e   : > { %458 = vmatprep.subr.mxu0 %v867_v2 }
  0x4f   : > { %459 = vmatpush1.msra.mxu0 %v400_v48 }
  0x50   : > { %484 = vmatprep.subr.mxu0 %v867_v2 }
  0x51   : > { %485 = vmatpush2.msra.mxu0 %v419_v49 }
  0x52   : > { %486 = vmatprep.subr.mxu0 %v867_v2 }
  0x53   : > { %487 = vmatpush2.msra.mxu0 %v418_v50 }
  0x54   : > { %488 = vmatprep.subr.mxu0 %v867_v2 }
  0x55   : > { %489 = vmatpush2.msra.mxu0 %v417_v51 }
  0x56   : > { %490 = vmatprep.subr.mxu0 %v867_v2 }
  0x57   : > { %491 = vmatpush2.msra.mxu0 %v416_v52 }
  0xee   : > { %v293_v32 = vpop.f32.mrf.mxu0 }
  0xef   : > { %v294_v33 = vadd.f32 %v693_v31, %v293_v32 }
  0xf0   : > { %v742_v34 = vpop.f32.mrf.mxu0 }
  0xf1   : > { %v298_v35 = vmin.f32 %v294_v33, 0.0  ;;  %vm297_vm2 = vcmp.gt.f32.partialorder %v294_v33, 0.0 }
  0xf3   : > { %v299_v36 = vmul.f32 1.442695, %v298_v35 }
  0xf5   : > { %814 = vpow2.f32 %v299_v36 }
 0x102   : > { %v815_v37 = vpop.eup %814 }
 0x103   : > { %v695_v38 = vadd.f32 -1.0, %v815_v37 }
 0x105   : > { %v302_v39 = vsel %vm297_vm2, %v294_v33, %v695_v38 }
 0x106   : > { %776 = vmatmul.mubr.f32.vlgmr.msra.gmra.mxu1 %v302_v39 }
 0x107   : > { %786 = vmatprep.mubr.msk.f32.mxu1 %vm868_vm0, %v867_v2  ;;  %779 = vmatpush3.msra.mxu1 %v525_v13 }
 0x108   : > { %780 = vmatprep.subr.mxu1 %v867_v2 }
 0x109   : > { %781 = vmatpush3.msra.mxu1 %v524_v14 }
 0x10a   : > { %782 = vmatprep.subr.mxu1 %v867_v2 }
 0x10b   : > { %783 = vmatpush3.msra.mxu1 %v523_v15 }
 0x10c   : > { %784 = vmatprep.subr.mxu1 %v867_v2  ;;  %v701_v2 = vld [vmem:[#allocation2 + $0x163] ss:$0 sm:$0xff] }
 0x10d   : > { %785 = vmatpush3.msra.mxu1 %v522_v16 }
 0x1c6   : > { %v390_v54 = vpop.f32.mrf.mxu1 }
 0x1c7   : > { %v391_v55 = vadd.f32 %v696_v53, %v390_v54 }
 0x1c8   : > { %v777_v56 = vpop.f32.mrf.mxu1 }
 0x1c9   : > { %v395_v57 = vmin.f32 %v391_v55, 0.0  ;;  %vm394_vm3 = vcmp.gt.f32.partialorder %v391_v55, 0.0 }
 0x1cb   : > { %v396_v58 = vmul.f32 1.442695, %v395_v57 }
 0x1cd   : > { %816 = vpow2.f32 %v396_v58 }
 0x1da   : > { %v817_v59 = vpop.eup %816 }
 0x1db   : > { %v697_v60 = vadd.f32 -1.0, %v817_v59 }
 0x1dd   : > { %v399_v61 = vsel %vm394_vm3, %v391_v55, %v697_v60 }
 0x1de   : > { %493 = vmatmul.mubr.f32.vlgmr.msra.gmra.mxu0 %v399_v61 }
 0x29e   : > { %v494_v63 = vpop.f32.mrf.mxu0 }
 0x29f   : > { %v495_v0 = vadd.f32 %v698_v62, %v494_v63 }
 0x2a0   : > { %v496_v1 = vpop.f32.mrf.mxu0 }
 0x2a1   : > { %818 = vtanh.f32 %v495_v0  ;;  %v700_v4 = vmul.f32 -1.442695, %v495_v0 }
 0x2a3   : > { %820 = vpow2.f32 %v700_v4 }
 0x2ae   : > { %v819_v3 = vpop.eup %818 }
 0x2af   : > { %507 = vrot.lane.b32.xlu0 %v819_v3, %s869_s13 }
 0x2b0   : > { %v821_v5 = vpop.eup %820 }
 0x2b1   : > { %v501_v6 = vadd.f32 1.0, %v821_v5 }
 0x2b3   : > { %822 = vrcp.f32 %v501_v6 }
 0x2c0   : > { %v823_v7 = vpop.eup %822 }
 0x2c1   : > { %v505_v10 = vmul.f32 %v823_v7, %v213_v46 }
 0x321   : > { %v508_v8 = vpop.permute.xlu0 %507 }
 0x322   : > { %v510_v9 = vmul.f32 %v823_v7, %v508_v8 }
 0x324   : > { %512 = vrot.lane.b32.xlu0 %v510_v9, %s870_s14 }
 0x396   : > { %v513_v11 = vpop.permute.xlu0 %512 }
 0x397   : > { %v515_v12 = vadd.f32 %v513_v11, %v505_v10 }
 0x399   : > { %824 = vtanh.f32 %v515_v12 }
 0x3a6   : > { %v825_v17 = vpop.eup %824 }
 0x3a7   : > { %518 = vrot.lane.b32.xlu1 %v825_v17, %s869_s13 }
 0x419   : > { %v519_v18 = vpop.permute.xlu1 %518 }
 0x41a   : > { %v521_v19 = vmul.f32 %v823_v7, %v519_v18 }
 0x41c   : > { %532 = vrot.lane.b32.xlu1 %v521_v19, %s870_s14 }
 0x48e   : > { %v533_v20 = vpop.permute.xlu1 %532 }
 0x48f   : > { %609 = vst.msk [vmem:[%s1013_s4] sm:$0x3] %vm608_vm4, %v533_v20  ;;  %787 = vmatmul.mubr.msk.f32.vlgmr.msra.gmra.mxu1 %vm223_vm1, %v533_v20 }
 0x490   : > { %611 = vst.msk [vmem:[%s1013_s4] sm:$0x3] %vm610_vm5, %v515_v12 }
 0x54f   : > { %v602_v21 = vpop.f32.mrf.mxu1 }
 0x550   : > { %v603_v22 = vadd.f32 %v701_v2, %v602_v21 }
 0x551   : > { %v788_v23 = vpop.f32.mrf.mxu1 }
 0x552   : > { %606 = vst [vmem:[%s933_s6] sm:$0x3] %v603_v22 }
 0x553 PF: > { %s16_s15 = sadd.s32 1, %s862_s15  }
 0x554   : > { %p13_p2 = scmp.ge.s32.totalorder %s16_s15, 10  }
 0x556   :  { %15 = sbr.rel (!%p13_p2) target bundleno = 1 (0x1), region = 79 }
 0x55b   :  { %637 = vsyncpa [#allocation3], 1 }
 0x55c   :  { %639 = vsyncpa [#allocation3 + $0x1], 1 }

</bundles_post_ra>
